<compile_context>
chip_gen: v6e
topology: v6e:2x2x1
jax: 0.10.0
libtpu: 0.0.40
codegen_flags: <defaults>
</compile_context>

<pallas_src>
import functools

import jax
import jax.numpy as jnp
from jax.experimental import pallas as pl
from jax.experimental.pallas import tpu as pltpu


def _rmsnorm_kernel(x_ref, w_ref, o_ref, *, eps):
    # Pass 1: row-wise mean of squares.  The f32 upcast used here does not
    # need to stay live across pass 2 (shrinks peak VMEM footprint).
    x = x_ref[...].astype(jnp.float32)
    mean_sq = jnp.mean(x * x, axis=-1, keepdims=True)            # (br, 1)
    inv = jax.lax.rsqrt(mean_sq + jnp.float32(eps))
    # Pass 2: re-read the tile (VMEM loads have huge slack under the HBM DMA)
    # and apply normalize + (1 + weight) scaling.
    scale = jnp.float32(1.0) + w_ref[...].astype(jnp.float32)    # (1, dim)
    y = (x_ref[...].astype(jnp.float32) * inv) * scale
    o_ref[...] = y.astype(o_ref.dtype)


def _tpu_generation():
    try:
        d = jax.devices()[0]
        if d.platform != "tpu":
            return None
        kind = d.device_kind.lower()
    except Exception:
        return None
    if "v5" in kind:
        return "v5e"
    if "v6" in kind:
        return "v6e"
    if "v7" in kind or "7x" in kind:
        return "v7x"
    return None


# generation -> (target per-buffer bytes, scoped-VMEM cap bytes, min grid steps)
_GEN_TUNING = {
    "v5e": (4 << 20, 48 << 20, 1),
    "v6e": (8 << 20, 80 << 20, 1),
    "v7x": (5 << 20, 48 << 20, 2),   # 64 MiB VMEM, 2 TCs/chip
    None:  (4 << 20, 48 << 20, 1),
}


def gemma2_rmsnorm(x: jax.Array, weight: jax.Array, *, eps: float = 1e-6,
                   target_block_bytes: int | None = None) -> jax.Array:
    """Gemma2 RMSNorm: x * rsqrt(mean(x^2, -1) + eps) * (1 + weight),
    computed in f32 and cast back to x.dtype."""
    orig_shape = x.shape
    orig_dtype = x.dtype
    dim = weight.shape[-1]
    assert orig_shape[-1] == dim, "last dim of x must match weight dim"

    # Flatten all leading dims into rows; the hidden dim is the lane axis.
    x2 = x.reshape(-1, dim)
    rows, cols = x2.shape
    if rows == 0:
        return x
    w2 = weight.reshape(1, dim)

    gen = _tpu_generation()
    gen_block, vmem_cap, min_steps = _GEN_TUNING.get(gen, _GEN_TUNING[None])
    if target_block_bytes is None:
        target_block_bytes = gen_block

    itemsize = jnp.dtype(orig_dtype).itemsize
    # Native sublane packing: 8 rows for 4-byte, 16 for bf16, 32 for 1-byte.
    sublane = 8 * max(1, 4 // itemsize)
    w_bytes = cols * jnp.dtype(weight.dtype).itemsize

    # Per-row VMEM cost: in + out tiles double-buffered in the original dtype
    # plus ~2 f32 compute temporaries (upcast tile, product/result tile).
    per_row_bytes = cols * (4 * itemsize + 2 * 4)
    slack = (2 << 20) + 2 * w_bytes
    br_cap_vmem = max(sublane, (vmem_cap - slack) // per_row_bytes)

    # Row tile from the per-generation target, clamped to the VMEM budget.
    br = max(1, target_block_bytes // max(1, cols * itemsize))
    br = min(br, br_cap_vmem)
    # Multi-TC chips (v7x): guarantee >= min_steps grid steps when possible so
    # the "parallel" grid axis keeps both TensorCores busy.
    if min_steps > 1 and rows >= min_steps * sublane:
        br = min(br, pl.cdiv(rows, min_steps))
    if br >= rows:
        br = rows
    else:
        br = max(sublane, (br // sublane) * sublane)
        if br >= rows:
            br = rows
    grid = (pl.cdiv(rows, br),)

    # Scoped-VMEM limit: double-buffered in/out tiles + f32 temps + weight.
    block_bytes = br * cols * itemsize
    f32_tile = br * cols * 4
    vmem_needed = 4 * block_bytes + 2 * f32_tile + 2 * w_bytes + (1 << 20)
    vmem_limit = int(min(vmem_cap, max(32 << 20, vmem_needed + (4 << 20))))

    out = pl.pallas_call(
        functools.partial(_rmsnorm_kernel, eps=float(eps)),
        out_shape=jax.ShapeDtypeStruct((rows, cols), orig_dtype),
        grid_spec=pltpu.PrefetchScalarGridSpec(
            num_scalar_prefetch=0,
            grid=grid,
            in_specs=[
                pl.BlockSpec((br, cols), lambda i: (i, 0)),   # x tile
                pl.BlockSpec((1, cols), lambda i: (0, 0)),    # weight (shared)
            ],
            out_specs=pl.BlockSpec((br, cols), lambda i: (i, 0)),
        ),
        compiler_params=pltpu.CompilerParams(
            dimension_semantics=("parallel",),
            vmem_limit_bytes=vmem_limit,
        ),
    )(x2, w2)

    return out.reshape(orig_shape)


def _rmsnorm_ref(x, weight, eps):
    xf = x.astype(jnp.float32)
    mean_sq = jnp.mean(xf * xf, axis=-1, keepdims=True)
    out = xf * jax.lax.rsqrt(mean_sq + jnp.float32(eps))
    out = out * (1.0 + weight.astype(jnp.float32))
    return out.astype(x.dtype)


if __name__ == "__main__":
    key = jax.random.PRNGKey(0)
    kx, kw, kx2, kx3 = jax.random.split(key, 4)
    eps = 1e-6

    # Small transformer-ish activation: (batch=2, seq=8, hidden=256).
    hidden = 256
    x = jax.random.normal(kx, (2, 8, hidden), dtype=jnp.float32)
    # Module initializes weight to zeros; use a small random weight so the
    # (1 + weight) scaling path is actually exercised.
    w = 0.1 * jax.random.normal(kw, (hidden,), dtype=jnp.float32)

    y = gemma2_rmsnorm(x, w, eps=eps)
    jax.block_until_ready(y)
    ref = _rmsnorm_ref(x, w, eps)
    assert y.shape == x.shape and y.dtype == x.dtype
    assert jnp.max(jnp.abs(y - ref)) < 1e-4

    # Ragged-grid path (rows not a multiple of the row tile): force a small
    # row tile so the masked last block is exercised.
    x_r = jax.random.normal(kx2, (3, 5, hidden), dtype=jnp.float32)  # 15 rows
    y_r = gemma2_rmsnorm(x_r, w, eps=eps, target_block_bytes=8 * hidden * 4)
    jax.block_until_ready(y_r)
    ref_r = _rmsnorm_ref(x_r, w, eps)
    assert jnp.max(jnp.abs(y_r - ref_r)) < 1e-4

    # bf16 path exercises the 16-row sublane-packing rounding and f32 upcast.
    x_b = jax.random.normal(kx3, (4, 7, hidden), dtype=jnp.bfloat16)  # 28 rows
    y_b = gemma2_rmsnorm(x_b, w, eps=eps, target_block_bytes=16 * hidden * 2)
    jax.block_until_ready(y_b)
    ref_b = _rmsnorm_ref(x_b, w, eps)
    assert y_b.dtype == x_b.dtype
    assert jnp.max(jnp.abs(y_b.astype(jnp.float32) -
                           ref_b.astype(jnp.float32))) < 5e-2

    print("KERNEL_OK")
</pallas_src>

<mosaic_0001>
module attributes {stable_mosaic.version = 11 : i64} {
  func.func @_rmsnorm_kernel(%arg0: i32, %arg1: memref<16x256xf32, #tpu.memory_space<vmem>>, %arg2: memref<1x256xf32, #tpu.memory_space<vmem>>, %arg3: memref<16x256xf32, #tpu.memory_space<vmem>>) attributes {dimension_semantics = [#tpu.dimension_semantics<parallel>], iteration_bounds = array<i64: 1>, scalar_prefetch = 0 : i64, scratch_operands = 0 : i64, tpu.core_type = #tpu.core_type<tc>, window_params = [{transform_indices = @transform_0, window_bounds = array<i64: 16, 256>}, {pipeline_mode = #tpu.pipeline_mode<synchronous>, transform_indices = @transform_1, window_bounds = array<i64: 1, 256>}, {transform_indices = @transform_2, window_bounds = array<i64: 16, 256>}]} {
    %c0 = arith.constant 0 : index
    %c0_0 = arith.constant 0 : index
    %0 = vector.load %arg1[%c0, %c0_0] : memref<16x256xf32, #tpu.memory_space<vmem>>, vector<16x256xf32>
    %1 = arith.mulf %0, %0 : vector<16x256xf32>
    %cst = arith.constant dense<0.000000e+00> : vector<16xf32>
    %2 = vector.multi_reduction <add>, %1, %cst [1] : vector<16x256xf32> to vector<16xf32>
    %3 = vector.shape_cast %2 : vector<16xf32> to vector<16x1xf32>
    %cst_1 = arith.constant 2.560000e+02 : f32
    %4 = vector.broadcast %cst_1 : f32 to vector<16x1xf32>
    %5 = arith.divf %3, %4 : vector<16x1xf32>
    %cst_2 = arith.constant 9.99999997E-7 : f32
    %6 = vector.broadcast %cst_2 : f32 to vector<16x1xf32>
    %7 = arith.addf %5, %6 : vector<16x1xf32>
    %8 = math.rsqrt %7 : vector<16x1xf32>
    %c0_3 = arith.constant 0 : index
    %c0_4 = arith.constant 0 : index
    %9 = vector.load %arg2[%c0_3, %c0_4] : memref<1x256xf32, #tpu.memory_space<vmem>>, vector<1x256xf32>
    %cst_5 = arith.constant 1.000000e+00 : f32
    %10 = vector.broadcast %cst_5 : f32 to vector<1x256xf32>
    %11 = arith.addf %10, %9 : vector<1x256xf32>
    %c0_6 = arith.constant 0 : index
    %c0_7 = arith.constant 0 : index
    %12 = vector.load %arg1[%c0_6, %c0_7] : memref<16x256xf32, #tpu.memory_space<vmem>>, vector<16x256xf32>
    %13 = vector.broadcast %8 : vector<16x1xf32> to vector<16x256xf32>
    %14 = arith.mulf %12, %13 : vector<16x256xf32>
    %15 = vector.broadcast %11 : vector<1x256xf32> to vector<16x256xf32>
    %16 = arith.mulf %14, %15 : vector<16x256xf32>
    %c0_8 = arith.constant 0 : index
    %c0_9 = arith.constant 0 : index
    %17 = vector.load %arg3[%c0_8, %c0_9] : memref<16x256xf32, #tpu.memory_space<vmem>>, vector<16x256xf32>
    tpu.vector_store %arg3[%c0_8, %c0_9], %16 {strides = array<i32>} : memref<16x256xf32, #tpu.memory_space<vmem>>, vector<16x256xf32>,
    return
  }
  func.func @transform_0(%arg0: i32) -> (i32, i32) {
    %c0_i32 = arith.constant 0 : i32
    %c0_i32_0 = arith.constant 0 : i32
    return %arg0, %c0_i32 : i32, i32
  }
  func.func @transform_1(%arg0: i32) -> (i32, i32) {
    %c0_i32 = arith.constant 0 : i32
    %c0_i32_0 = arith.constant 0 : i32
    %c0_i32_1 = arith.constant 0 : i32
    return %c0_i32, %c0_i32_0 : i32, i32
  }
  func.func @transform_2(%arg0: i32) -> (i32, i32) {
    %c0_i32 = arith.constant 0 : i32
    %c0_i32_0 = arith.constant 0 : i32
    return %arg0, %c0_i32 : i32, i32
  }
}

</mosaic_0001>

<bundles_post_ra>
// kernel: tpu_custom_call.1
= control target key start
LH: loop header
LB: loop body
LE: loop exit
PB: predicated region body
PF: predicated region fallthrough
CT: control target
= control target key end

     0   :  { %7 = vsyncpa [#allocation3], 0  ;;  %s212_s0 = inlined_call_operand.hbm [shape: f32[16,256], index: 0, kind: input, shape index: {}]   ;;  %s213_s1 = inlined_call_operand.hbm [shape: f32[1,256], index: 1, kind: input, shape index: {}]   ;;  %s214_s2 = inlined_call_operand.hbm [shape: f32[16,256], index: 2, kind: output, shape index: {}]  }
   0x1   :  { %8 = vsyncpa [#allocation6], 0 }
   0x2   :  { %9 = vsyncpa [#allocation4], 0  ;;  %s177_s9 = smov [#allocation2]  }
   0x3   :  { %s15_s10 = sshll.u32 %s177_s9, 4  ;;  %s16_s10 = int_to_ptr.vmem [resolvable:$true] %s15_s10 }
   0x4   :  { %s119_s11 = scalar_lea.vmem %s16_s10, 512  ;;  %p124_p1 = scmp.lt.s32.totalorder %s16_s10, %s16_s10 }
   0x5   :  { %p120_p0 = scmp.ne.s32.totalorder %s16_s10, %s119_s11  ;;  %p125_p2 = scmp.lt.s32.totalorder %s119_s11, %s119_s11 }
   0x7   :  { %p126_p3 = por %p125_p2, %p124_p1 }
   0x9   :  { %p127_p4 = pnand %p126_p3, %p120_p0 }
   0xb   :  { %130 = shalt.err (!%p127_p4)
}
   0xc   :  { %s178_s12 = smov 256   ;;  %s179_s13 = smov 16  }
   0xd   :  { %21 = dma.hbm_to_vmem [thread:$0]  %s212_s0, 512, %s16_s10, [#allocation3], %s178_s12, %s178_s12, %s179_s13  }
   0xe   :  { %s180_s16 = smov [#allocation5]  }
   0xf   :  { %s28_s17 = sshll.u32 %s180_s16, 4  ;;  %s29_s17 = int_to_ptr.vmem [resolvable:$true] %s28_s17 }
  0x10   :  { %s139_s18 = scalar_lea.vmem %s29_s17, 32  ;;  %p144_p6 = scmp.lt.s32.totalorder %s29_s17, %s29_s17 }
  0x11   :  { %p140_p5 = scmp.ne.s32.totalorder %s29_s17, %s139_s18  ;;  %p145_p7 = scmp.lt.s32.totalorder %s139_s18, %s139_s18 }
  0x13   :  { %p146_p8 = por %p145_p7, %p144_p6 }
  0x15   :  { %p147_p9 = pnand %p146_p8, %p140_p5 }
  0x17   :  { %150 = shalt.err (!%p147_p9)
}
  0x18   :  { %31 = dma.hbm_to_vmem [thread:$0]  %s213_s1, 32, %s29_s17, [#allocation6]  }
  0x19   :  { %171 = dma.done.wait [#allocation3], 512  }
  0x1a   :  { %172 = vsyncadd [#allocation3], 4294966784 }
  0x1b   :  { %173 = dma.done.wait [#allocation6], 32  }
  0x1c   :  { %174 = vsyncadd [#allocation6], 4294967264  ;;  %v38_v0 = vld [vmem:[#allocation2] sm:$0xff]  ;;  %v39_v1 = vld [vmem:[#allocation2 + $0x8] sm:$0xff]  ;;  %v66_v15 = vlaneseq  ;;  %s181_s0 = smov [#allocation7]  }
  0x1d   :  { %v40_v2 = vld [vmem:[#allocation2 + $0x10] sm:$0xff]  ;;  %v42_v3 = vmul.f32 %v38_v0, %v38_v0  ;;  %v43_v4 = vmul.f32 %v39_v1, %v39_v1  ;;  %v41_v5 = vld [vmem:[#allocation2 + $0x18] sm:$0xff]  ;;  %v59_v18 = vld [vmem:[#allocation5] sm:$0x3]  ;;  %s89_s1 = sshll.u32 %s181_s0, 4  ;;  %s90_s1 = int_to_ptr.vmem [resolvable:$true] %s89_s1 }
  0x1e   :  { %v44_v6 = vmul.f32 %v40_v2, %v40_v2  ;;  %v45_v7 = vmul.f32 %v41_v5, %v41_v5  ;;  %v67_v17 = vshrl.u32 %v66_v15, 7  ;;  %v60_v19 = vadd.f32 1.0, %v59_v18  ;;  %s151_s21 = scalar_lea.vmem %s90_s1, 512  ;;  %p156_p11 = scmp.lt.s32.totalorder %s90_s1, %s90_s1 }
  0x1f   :  { %v46_v8 = vadd.f32 %v43_v4, %v42_v3  ;;  %p152_p10 = scmp.ne.s32.totalorder %s90_s1, %s151_s21  ;;  %p157_p12 = scmp.lt.s32.totalorder %s151_s21, %s151_s21 }
  0x20   :  { %v49_v9 = vadd.f32 %v45_v7, %v44_v6  ;;  %v68_v20 = vsub.s32 0, %v67_v17  ;;  %v72_v21 = vsub.s32 1, %v67_v17 }
  0x21   :  { %47 = vadd.xlane.f32.xlu0 %v46_v8  ;;  %p158_p13 = por %p157_p12, %p156_p11 }
  0x22   :  { %v69_v22 = vrot.slane %v60_v19, %v68_v20  ;;  %v73_v23 = vrot.slane %v60_v19, %v72_v21 }
  0x23   :  { %p159_p0 = pnand %p158_p13, %p152_p10 }
  0x25   :  { %50 = vadd.xlane.f32.xlu0 %v49_v9 }
  0xaa   :  { %v48_v10 = vpop.xlane.xlu0 %47 }
  0xab   :  { %v53_v11 = vmul.f32 0.00390625, %v48_v10 }
  0xad   :  { %v55_v12 = vadd.f32 1e-06, %v53_v11 }
  0xae   :  { %v51_v13 = vpop.xlane.xlu0 %50 }
  0xaf   :  { %107 = vrsqrt.f32 %v55_v12  ;;  %v54_v14 = vmul.f32 0.00390625, %v51_v13 }
  0xb1   :  { %v56_v16 = vadd.f32 1e-06, %v54_v14 }
  0xb3   :  { %109 = vrsqrt.f32 %v56_v16 }
  0xbc   :  { %v108_v24 = vpop.eup %107 }
  0xbd   :  { %v61_v25 = vmul.f32 %v108_v24, %v38_v0  ;;  %v62_v26 = vmul.f32 %v108_v24, %v39_v1 }
  0xbf   :  { %v76_v27 = vmul.f32 %v69_v22, %v61_v25  ;;  %v77_v28 = vmul.f32 %v73_v23, %v62_v26 }
  0xc0   :  { %v110_v29 = vpop.eup %109 }
  0xc1   :  { %v63_v30 = vmul.f32 %v110_v29, %v40_v2  ;;  %v64_v31 = vmul.f32 %v110_v29, %v41_v5  ;;  %80 = vst [vmem:[#allocation7] sm:$0xff] %v76_v27  ;;  %81 = vst [vmem:[#allocation7 + $0x8] sm:$0xff] %v77_v28 }
  0xc3   :  { %v78_v32 = vmul.f32 %v69_v22, %v63_v30  ;;  %v79_v33 = vmul.f32 %v73_v23, %v64_v31 }
  0xc5   :  { %82 = vst [vmem:[#allocation7 + $0x10] sm:$0xff] %v78_v32  ;;  %83 = vst [vmem:[#allocation7 + $0x18] sm:$0xff] %v79_v33 }
  0xc6   :  { %162 = shalt.err (!%p159_p0)
}
  0xc7   :  { %95 = dma.vmem_to_hbm [thread:$0]  %s90_s1, 512, %s214_s2, [#allocation4], %s178_s12, %s178_s12, %s179_s13  }
  0xc8   :  { %175 = dma.done.wait [#allocation4], 512  }
  0xc9   :  { %176 = vsyncadd [#allocation4], 4294966784 }
  0xca   :  { %99 = vsyncpa [#allocation3], 1 }
  0xcb   :  { %100 = vsyncpa [#allocation6], 1 }
  0xcc   :  { %101 = vsyncpa [#allocation4], 1 }

</bundles_post_ra>
